<compile_context>
chip_gen: v6e
topology: v6e:2x2x1
jax: 0.10.0
libtpu: 0.0.40
codegen_flags: <defaults>
</compile_context>

<pallas_src>
import functools

import jax
import jax.numpy as jnp
from jax.experimental import pallas as pl
from jax.experimental.pallas import tpu as pltpu

EPS = 1e-5
LANE = 128


def _round_up(x, m):
    return (x + m - 1) // m * m


def _vmem_cap_bytes():
    """Generation-aware VMEM budget: ~3/4 of physical per-core VMEM."""
    try:
        cap = int(pltpu.get_tpu_info().vmem_capacity_bytes)
    except Exception:
        cap = 128 << 20          # conservative default if query unavailable
    return cap * 3 // 4          # headroom for compiler scratch / DMA staging


# ---------------------------------------------------------------------------
# Kernels
#   vecs_ref is a single (8, F) tile: row 0 = g1, 1 = be1, 2 = g2, 3 = be2(+bp)
# ---------------------------------------------------------------------------
def _residual_mlp_kernel_proj(x_ref, w1wp_ref, w2_ref, vecs_ref, o_ref):
    fp = o_ref.shape[1]
    inv_n = 1.0 / x_ref.shape[0]
    x = x_ref[...]

    # One MXU pass over x feeds both the first Linear and the residual projection.
    fused = jnp.dot(x, w1wp_ref[...], preferred_element_type=jnp.float32)
    h_pre = fused[:, :fp]          # pre-BN1 activations (bias dropped: BN cancels it)
    proj = fused[:, fp:]           # residual projection (bias folded into row 3 of vecs)

    g1, be1 = vecs_ref[0:1, :], vecs_ref[1:2, :]
    g2, be2 = vecs_ref[2:3, :], vecs_ref[3:4, :]

    # BN1 (batch stats, one-pass sufficient statistics) folded into scale/shift, then ReLU.
    mu1 = jnp.sum(h_pre, axis=0, keepdims=True) * inv_n
    var1 = jnp.maximum(jnp.sum(h_pre * h_pre, axis=0, keepdims=True) * inv_n - mu1 * mu1, 0.0)
    s1 = g1 * jax.lax.rsqrt(var1 + EPS)
    t1 = be1 - mu1 * s1
    h = jnp.maximum(h_pre * s1 + t1, 0.0)

    # Second Linear (bias dropped) + BN2 folded into scale/shift.
    h2_pre = jnp.dot(h, w2_ref[...], preferred_element_type=jnp.float32)
    mu2 = jnp.sum(h2_pre, axis=0, keepdims=True) * inv_n
    var2 = jnp.maximum(jnp.sum(h2_pre * h2_pre, axis=0, keepdims=True) * inv_n - mu2 * mu2, 0.0)
    s2 = g2 * jax.lax.rsqrt(var2 + EPS)
    t2 = be2 - mu2 * s2            # bp already folded into be2 on the host

    o_ref[...] = jnp.maximum(h2_pre * s2 + t2 + proj, 0.0)


def _residual_mlp_kernel_same(x_ref, w1_ref, w2_ref, vecs_ref, o_ref):
    inv_n = 1.0 / x_ref.shape[0]
    x = x_ref[...]

    g1, be1 = vecs_ref[0:1, :], vecs_ref[1:2, :]
    g2, be2 = vecs_ref[2:3, :], vecs_ref[3:4, :]

    h_pre = jnp.dot(x, w1_ref[...], preferred_element_type=jnp.float32)
    mu1 = jnp.sum(h_pre, axis=0, keepdims=True) * inv_n
    var1 = jnp.maximum(jnp.sum(h_pre * h_pre, axis=0, keepdims=True) * inv_n - mu1 * mu1, 0.0)
    s1 = g1 * jax.lax.rsqrt(var1 + EPS)
    t1 = be1 - mu1 * s1
    h = jnp.maximum(h_pre * s1 + t1, 0.0)

    h2_pre = jnp.dot(h, w2_ref[...], preferred_element_type=jnp.float32)
    mu2 = jnp.sum(h2_pre, axis=0, keepdims=True) * inv_n
    var2 = jnp.maximum(jnp.sum(h2_pre * h2_pre, axis=0, keepdims=True) * inv_n - mu2 * mu2, 0.0)
    s2 = g2 * jax.lax.rsqrt(var2 + EPS)
    t2 = be2 - mu2 * s2

    o_ref[...] = jnp.maximum(h2_pre * s2 + t2 + x, 0.0)


# ---------------------------------------------------------------------------
# Parameters (PyTorch-default-style init), stored pre-transposed as (in, out)
# ---------------------------------------------------------------------------
def init_params(key, in_features, out_features):
    def linear(k, fan_in, fan_out):
        k_w, k_b = jax.random.split(k)
        bound = 1.0 / jnp.sqrt(fan_in)
        w = jax.random.uniform(k_w, (fan_in, fan_out), jnp.float32, -bound, bound)
        b = jax.random.uniform(k_b, (1, fan_out), jnp.float32, -bound, bound)
        return w, b

    k1, k2, kp = jax.random.split(key, 3)
    w1, b1 = linear(k1, in_features, out_features)
    w2, b2 = linear(k2, out_features, out_features)
    params = dict(
        w1=w1, b1=b1, w2=w2, b2=b2,
        g1=jnp.ones((1, out_features), jnp.float32),
        be1=jnp.zeros((1, out_features), jnp.float32),
        g2=jnp.ones((1, out_features), jnp.float32),
        be2=jnp.zeros((1, out_features), jnp.float32),
    )
    if in_features != out_features:
        wp, bp = linear(kp, in_features, out_features)
        params.update(wp=wp, bp=bp)
    return params


# ---------------------------------------------------------------------------
# One-time parameter packing (hoisted out of the per-call path)
# ---------------------------------------------------------------------------
def pack_params(params, in_features, out_features):
    """Pad/pack weights once; reuse the result across forward calls."""
    same_dim = in_features == out_features
    kp = _round_up(in_features, LANE)    # padded K (lane-dense matmul operand)
    fp = _round_up(out_features, LANE)   # padded F (lane-dense result / stores)

    def pad_mat(w, rows, cols):
        return jnp.pad(w, ((0, rows - w.shape[0]), (0, cols - w.shape[1])))

    def pad_row(v):
        return jnp.pad(v, ((0, 0), (0, fp - v.shape[1])))

    w1p = pad_mat(params["w1"], kp, fp)
    w2p = pad_mat(params["w2"], fp, fp)

    be2 = params["be2"]
    if same_dim:
        w_first = w1p
    else:
        be2 = be2 + params["bp"]                               # fold bp into BN2 shift
        w_first = jnp.concatenate([w1p, pad_mat(params["wp"], kp, fp)], axis=1)

    # Single sublane-aligned (8, fp) tile for all per-feature vectors.
    vecs = jnp.concatenate(
        [pad_row(params["g1"]), pad_row(params["be1"]),
         pad_row(params["g2"]), pad_row(be2),
         jnp.zeros((4, fp), jnp.float32)], axis=0)

    return dict(
        w_first=jax.device_put(w_first),
        w2=jax.device_put(w2p),
        vecs=jax.device_put(vecs),
        same_dim=same_dim, kp=kp, fp=fp, out_features=out_features,
    )


# ---------------------------------------------------------------------------
# Forward wrapper: only pads x per call, then a single gridless pallas_call.
# ---------------------------------------------------------------------------
@functools.partial(jax.jit, static_argnames=("same_dim", "kp", "fp", "out_features"))
def _forward(x, w_first, w2, vecs, *, same_dim, kp, fp, out_features):
    n = x.shape[0]
    # NOTE: never pad the batch (N) axis — padded rows would corrupt BN statistics.
    xp = jnp.pad(x, ((0, 0), (0, kp - x.shape[1])))

    kernel = _residual_mlp_kernel_same if same_dim else _residual_mlp_kernel_proj
    w_cols = w_first.shape[1]

    # Rough f32 VMEM budget (inputs + intermediates + output) with headroom,
    # clamped to a generation-aware fraction of physical per-core VMEM.
    est = 4 * (n * kp + kp * w_cols + fp * fp + 6 * n * fp + 8 * fp) + (8 << 20)
    vmem_limit = int(min(max(est, 8 << 20), _vmem_cap_bytes()))

    vmem = pl.BlockSpec(memory_space=pltpu.MemorySpace.VMEM)
    out_padded = pl.pallas_call(
        kernel,
        out_shape=jax.ShapeDtypeStruct((n, fp), jnp.float32),
        in_specs=[vmem, vmem, vmem, vmem],
        out_specs=vmem,
        compiler_params=pltpu.CompilerParams(vmem_limit_bytes=vmem_limit),
    )(xp, w_first, w2, vecs)

    return out_padded[:, :out_features]


def residual_mlp_block(x, packed):
    return _forward(x, packed["w_first"], packed["w2"], packed["vecs"],
                    same_dim=packed["same_dim"], kp=packed["kp"],
                    fp=packed["fp"], out_features=packed["out_features"])


# ---------------------------------------------------------------------------
# Pure-JAX reference (faithful to the PyTorch module, biases included)
# ---------------------------------------------------------------------------
def reference(x, params, in_features, out_features):
    def bn(h):
        mu = jnp.mean(h, axis=0, keepdims=True)
        var = jnp.mean((h - mu) ** 2, axis=0, keepdims=True)
        return (h - mu) / jnp.sqrt(var + EPS)

    h = jnp.maximum(bn(x @ params["w1"] + params["b1"]) * params["g1"] + params["be1"], 0.0)
    h2 = bn(h @ params["w2"] + params["b2"]) * params["g2"] + params["be2"]
    res = x if in_features == out_features else x @ params["wp"] + params["bp"]
    return jnp.maximum(h2 + res, 0.0)


if __name__ == "__main__":
    key = jax.random.PRNGKey(0)

    # Case 1: projection path (in_features != out_features)
    batch, in_f, out_f = 8, 16, 32
    k_x, k_p, key = jax.random.split(key, 3)
    x = jax.random.normal(k_x, (batch, in_f), jnp.float32)
    params = init_params(k_p, in_f, out_f)
    packed = pack_params(params, in_f, out_f)
    out = jax.block_until_ready(residual_mlp_block(x, packed))
    ref = reference(x, params, in_f, out_f)
    assert out.shape == (batch, out_f)
    assert jnp.allclose(out, ref, atol=1e-4, rtol=1e-4), "projection-path mismatch"

    # Case 2: identity-residual path (in_features == out_features)
    batch, in_f, out_f = 8, 32, 32
    k_x, k_p = jax.random.split(key)
    x = jax.random.normal(k_x, (batch, in_f), jnp.float32)
    params = init_params(k_p, in_f, out_f)
    packed = pack_params(params, in_f, out_f)
    out = jax.block_until_ready(residual_mlp_block(x, packed))
    ref = reference(x, params, in_f, out_f)
    assert out.shape == (batch, out_f)
    assert jnp.allclose(out, ref, atol=1e-4, rtol=1e-4), "same-dim-path mismatch"

    print("KERNEL_OK")
</pallas_src>

<mosaic_0001>
module attributes {stable_mosaic.version = 11 : i64} {
  func.func @_residual_mlp_kernel_proj(%arg0: memref<8x128xf32, #tpu.memory_space<vmem>>, %arg1: memref<128x256xf32, #tpu.memory_space<vmem>>, %arg2: memref<128x128xf32, #tpu.memory_space<vmem>>, %arg3: memref<8x128xf32, #tpu.memory_space<vmem>>, %arg4: memref<8x128xf32, #tpu.memory_space<vmem>>) attributes {dimension_semantics = [], scalar_prefetch = 0 : i64, scratch_operands = 0 : i64, tpu.core_type = #tpu.core_type<tc>} {
    %c0 = arith.constant 0 : index
    %c0_0 = arith.constant 0 : index
    %0 = vector.load %arg0[%c0, %c0_0] : memref<8x128xf32, #tpu.memory_space<vmem>>, vector<8x128xf32>
    %c0_1 = arith.constant 0 : index
    %c0_2 = arith.constant 0 : index
    %1 = vector.load %arg1[%c0_1, %c0_2] : memref<128x256xf32, #tpu.memory_space<vmem>>, vector<128x256xf32>
    %cst = arith.constant dense<0.000000e+00> : vector<8x256xf32>
    %2 = tpu.matmul %0, %1, %cst {dimension_numbers = #tpu.dot_dimension_numbers<[1], [0], [0], [1], [0, 0, 1, 1], [], []>} : vector<8x128xf32>, vector<128x256xf32>, vector<8x256xf32> -> vector<8x256xf32>
    %3 = vector.extract_strided_slice %2 {offsets = [0, 0], sizes = [8, 128], strides = [1, 1]} : vector<8x256xf32> to vector<8x128xf32>
    %4 = vector.extract_strided_slice %2 {offsets = [0, 128], sizes = [8, 128], strides = [1, 1]} : vector<8x256xf32> to vector<8x128xf32>
    %c0_3 = arith.constant 0 : index
    %c0_4 = arith.constant 0 : index
    %5 = vector.load %arg3[%c0_3, %c0_4] : memref<8x128xf32, #tpu.memory_space<vmem>>, vector<1x128xf32>
    %c1 = arith.constant 1 : index
    %c0_5 = arith.constant 0 : index
    %6 = vector.load %arg3[%c1, %c0_5] : memref<8x128xf32, #tpu.memory_space<vmem>>, vector<1x128xf32>
    %c2 = arith.constant 2 : index
    %c0_6 = arith.constant 0 : index
    %7 = vector.load %arg3[%c2, %c0_6] : memref<8x128xf32, #tpu.memory_space<vmem>>, vector<1x128xf32>
    %c3 = arith.constant 3 : index
    %c0_7 = arith.constant 0 : index
    %8 = vector.load %arg3[%c3, %c0_7] : memref<8x128xf32, #tpu.memory_space<vmem>>, vector<1x128xf32>
    %cst_8 = arith.constant dense<0.000000e+00> : vector<128xf32>
    %9 = vector.multi_reduction <add>, %3, %cst_8 [0] : vector<8x128xf32> to vector<128xf32>
    %10 = vector.shape_cast %9 : vector<128xf32> to vector<1x128xf32>
    %cst_9 = arith.constant 1.250000e-01 : f32
    %11 = vector.broadcast %cst_9 : f32 to vector<1x128xf32>
    %12 = arith.mulf %10, %11 : vector<1x128xf32>
    %13 = arith.mulf %3, %3 : vector<8x128xf32>
    %cst_10 = arith.constant dense<0.000000e+00> : vector<128xf32>
    %14 = vector.multi_reduction <add>, %13, %cst_10 [0] : vector<8x128xf32> to vector<128xf32>
    %15 = vector.shape_cast %14 : vector<128xf32> to vector<1x128xf32>
    %cst_11 = arith.constant 1.250000e-01 : f32
    %16 = vector.broadcast %cst_11 : f32 to vector<1x128xf32>
    %17 = arith.mulf %15, %16 : vector<1x128xf32>
    %18 = arith.mulf %12, %12 : vector<1x128xf32>
    %19 = arith.subf %17, %18 : vector<1x128xf32>
    %cst_12 = arith.constant 0.000000e+00 : f32
    %20 = vector.broadcast %cst_12 : f32 to vector<1x128xf32>
    %21 = arith.maximumf %19, %20 : vector<1x128xf32>
    %cst_13 = arith.constant 9.99999974E-6 : f32
    %22 = vector.broadcast %cst_13 : f32 to vector<1x128xf32>
    %23 = arith.addf %21, %22 : vector<1x128xf32>
    %24 = math.rsqrt %23 : vector<1x128xf32>
    %25 = arith.mulf %5, %24 : vector<1x128xf32>
    %26 = arith.mulf %12, %25 : vector<1x128xf32>
    %27 = arith.subf %6, %26 : vector<1x128xf32>
    %28 = vector.broadcast %25 : vector<1x128xf32> to vector<8x128xf32>
    %29 = arith.mulf %3, %28 : vector<8x128xf32>
    %30 = vector.broadcast %27 : vector<1x128xf32> to vector<8x128xf32>
    %31 = arith.addf %29, %30 : vector<8x128xf32>
    %cst_14 = arith.constant 0.000000e+00 : f32
    %32 = vector.broadcast %cst_14 : f32 to vector<8x128xf32>
    %33 = arith.maximumf %31, %32 : vector<8x128xf32>
    %c0_15 = arith.constant 0 : index
    %c0_16 = arith.constant 0 : index
    %34 = vector.load %arg2[%c0_15, %c0_16] : memref<128x128xf32, #tpu.memory_space<vmem>>, vector<128x128xf32>
    %cst_17 = arith.constant dense<0.000000e+00> : vector<8x128xf32>
    %35 = tpu.matmul %33, %34, %cst_17 {dimension_numbers = #tpu.dot_dimension_numbers<[1], [0], [0], [1], [0, 0, 1, 1], [], []>} : vector<8x128xf32>, vector<128x128xf32>, vector<8x128xf32> -> vector<8x128xf32>
    %cst_18 = arith.constant dense<0.000000e+00> : vector<128xf32>
    %36 = vector.multi_reduction <add>, %35, %cst_18 [0] : vector<8x128xf32> to vector<128xf32>
    %37 = vector.shape_cast %36 : vector<128xf32> to vector<1x128xf32>
    %cst_19 = arith.constant 1.250000e-01 : f32
    %38 = vector.broadcast %cst_19 : f32 to vector<1x128xf32>
    %39 = arith.mulf %37, %38 : vector<1x128xf32>
    %40 = arith.mulf %35, %35 : vector<8x128xf32>
    %cst_20 = arith.constant dense<0.000000e+00> : vector<128xf32>
    %41 = vector.multi_reduction <add>, %40, %cst_20 [0] : vector<8x128xf32> to vector<128xf32>
    %42 = vector.shape_cast %41 : vector<128xf32> to vector<1x128xf32>
    %cst_21 = arith.constant 1.250000e-01 : f32
    %43 = vector.broadcast %cst_21 : f32 to vector<1x128xf32>
    %44 = arith.mulf %42, %43 : vector<1x128xf32>
    %45 = arith.mulf %39, %39 : vector<1x128xf32>
    %46 = arith.subf %44, %45 : vector<1x128xf32>
    %cst_22 = arith.constant 0.000000e+00 : f32
    %47 = vector.broadcast %cst_22 : f32 to vector<1x128xf32>
    %48 = arith.maximumf %46, %47 : vector<1x128xf32>
    %cst_23 = arith.constant 9.99999974E-6 : f32
    %49 = vector.broadcast %cst_23 : f32 to vector<1x128xf32>
    %50 = arith.addf %48, %49 : vector<1x128xf32>
    %51 = math.rsqrt %50 : vector<1x128xf32>
    %52 = arith.mulf %7, %51 : vector<1x128xf32>
    %53 = arith.mulf %39, %52 : vector<1x128xf32>
    %54 = arith.subf %8, %53 : vector<1x128xf32>
    %55 = vector.broadcast %52 : vector<1x128xf32> to vector<8x128xf32>
    %56 = arith.mulf %35, %55 : vector<8x128xf32>
    %57 = vector.broadcast %54 : vector<1x128xf32> to vector<8x128xf32>
    %58 = arith.addf %56, %57 : vector<8x128xf32>
    %59 = arith.addf %58, %4 : vector<8x128xf32>
    %cst_24 = arith.constant 0.000000e+00 : f32
    %60 = vector.broadcast %cst_24 : f32 to vector<8x128xf32>
    %61 = arith.maximumf %59, %60 : vector<8x128xf32>
    %c0_25 = arith.constant 0 : index
    %c0_26 = arith.constant 0 : index
    %62 = vector.load %arg4[%c0_25, %c0_26] : memref<8x128xf32, #tpu.memory_space<vmem>>, vector<8x128xf32>
    tpu.vector_store %arg4[%c0_25, %c0_26], %61 {strides = array<i32>} : memref<8x128xf32, #tpu.memory_space<vmem>>, vector<8x128xf32>,
    return
  }
}

</mosaic_0001>

<bundles_post_ra>
// kernel: _forward.1
= control target key start
LH: loop header
LB: loop body
LE: loop exit
PB: predicated region body
PF: predicated region fallthrough
CT: control target
= control target key end

     0   :  { %9 = vsyncpa [#allocation3], 0  ;;  %s533_s0 = inlined_call_operand.vmem [shape: f32[8,128], index: 0, kind: input, shape index: {}]   ;;  %s534_s1 = inlined_call_operand.hbm [shape: f32[128,256], index: 1, kind: input, shape index: {}]   ;;  %s535_s2 = inlined_call_operand.hbm [shape: f32[128,128], index: 2, kind: input, shape index: {}]   ;;  %s536_s3 = inlined_call_operand.vmem [shape: f32[8,128], index: 3, kind: input, shape index: {}]   ;;  %s537_s4 = inlined_call_operand.hbm [shape: f32[8,128], index: 4, kind: output, shape index: {}]  }
   0x1   :  { %10 = vsyncpa [#allocation6], 0 }
   0x2   :  { %11 = vsyncpa [#allocation4], 0  ;;  %s457_s15 = smov [#allocation2]  }
   0x3   :  { %s19_s16 = sshll.u32 %s457_s15, 4  ;;  %s20_s16 = int_to_ptr.vmem [resolvable:$true] %s19_s16 }
   0x4   :  { %s399_s17 = scalar_lea.vmem %s20_s16, 4096  ;;  %p404_p1 = scmp.lt.s32.totalorder %s20_s16, %s20_s16 }
   0x5   :  { %p400_p0 = scmp.ne.s32.totalorder %s20_s16, %s399_s17  ;;  %p405_p2 = scmp.lt.s32.totalorder %s399_s17, %s399_s17 }
   0x7   :  { %p406_p3 = por %p405_p2, %p404_p1 }
   0x9   :  { %p407_p4 = pnand %p406_p3, %p400_p0 }
   0xb   :  { %410 = shalt.err (!%p407_p4)
}
   0xc   :  { %s458_s18 = smov 256   ;;  %s459_s19 = smov 16  }
   0xd   :  { %25 = dma.hbm_to_vmem [thread:$0]  %s534_s1, 4096, %s20_s16, [#allocation3], %s458_s18, %s458_s18, %s459_s19  }
   0xe   :  { %s460_s22 = smov [#allocation5]  }
   0xf   :  { %s31_s23 = sshll.u32 %s460_s22, 4  ;;  %s32_s23 = int_to_ptr.vmem [resolvable:$true] %s31_s23 }
  0x10   :  { %s419_s24 = scalar_lea.vmem %s32_s23, 2048  ;;  %p424_p6 = scmp.lt.s32.totalorder %s32_s23, %s32_s23 }
  0x11   :  { %p420_p5 = scmp.ne.s32.totalorder %s32_s23, %s419_s24  ;;  %p425_p7 = scmp.lt.s32.totalorder %s419_s24, %s419_s24 }
  0x13   :  { %p426_p8 = por %p425_p7, %p424_p6 }
  0x15   :  { %p427_p9 = pnand %p426_p8, %p420_p5 }
  0x17   :  { %430 = shalt.err (!%p427_p9)
}
  0x18   :  { %s461_s25 = smov 128   ;;  %s462_s26 = smov 8  }
  0x19   :  { %37 = dma.hbm_to_vmem [thread:$0]  %s535_s2, 2048, %s32_s23, [#allocation6], %s461_s25, %s461_s25, %s462_s26  }
  0x1a   :  { %451 = dma.done.wait [#allocation3], 4096  }
  0x1b   :  { %452 = vsyncadd [#allocation3], 4294963200 }
  0x1c   :  { %453 = dma.done.wait [#allocation6], 2048  }
  0x1d   :  { %454 = vsyncadd [#allocation6], 4294965248  ;;  %v463_v0 = vmov 0.0   ;;  %v78_v1 = vld [vmem:[#allocation2 + $0xf8] sm:$0xff]  ;;  %v77_v2 = vld [vmem:[#allocation2 + $0xf0] sm:$0xff]  ;;  %vm464_vm0 = vmmov 0  }
  0x1e   :  { %143 = vmatprep.mubr.f32.mxu0 %v463_v0  ;;  %343 = vmatprep.subr.mxu1 %v463_v0  ;;  %v76_v3 = vld [vmem:[#allocation2 + $0xe8] sm:$0xff]  ;;  %v75_v4 = vld [vmem:[#allocation2 + $0xe0] sm:$0xff]  ;;  %v74_v5 = vld [vmem:[#allocation2 + $0xd8] sm:$0xff]  ;;  %s465_s10 = smov [#allocation7]  }
  0x1f   :  { %79 = vmatprep.subr.mxu0 %v78_v1  ;;  %v73_v6 = vld [vmem:[#allocation2 + $0xd0] sm:$0xff]  ;;  %v72_v7 = vld [vmem:[#allocation2 + $0xc8] sm:$0xff]  ;;  %v71_v8 = vld [vmem:[#allocation2 + $0xc0] sm:$0xff]  ;;  %375 = vmatprep.mubr.msk.f32.mxu1 %vm464_vm0, %v463_v0  ;;  %s316_s11 = sshll.u32 %s465_s10, 4  ;;  %s317_s11 = int_to_ptr.vmem [resolvable:$true] %s316_s11 }
  0x20   :  { %80 = vmatpush1.msra.mxu0 %v77_v2  ;;  %v70_v9 = vld [vmem:[#allocation2 + $0xb8] sm:$0xff]  ;;  %v69_v10 = vld [vmem:[#allocation2 + $0xb0] sm:$0xff]  ;;  %v68_v11 = vld [vmem:[#allocation2 + $0xa8] sm:$0xff]  ;;  %s431_s12 = scalar_lea.vmem %s317_s11, 128  ;;  %p436_p11 = scmp.lt.s32.totalorder %s317_s11, %s317_s11 }
  0x21   :  { %81 = vmatprep.subr.mxu0 %v76_v3  ;;  %v67_v12 = vld [vmem:[#allocation2 + $0xa0] sm:$0xff]  ;;  %v66_v13 = vld [vmem:[#allocation2 + $0x98] sm:$0xff]  ;;  %v65_v14 = vld [vmem:[#allocation2 + $0x90] sm:$0xff]  ;;  %p432_p10 = scmp.ne.s32.totalorder %s317_s11, %s431_s12  ;;  %p437_p12 = scmp.lt.s32.totalorder %s431_s12, %s431_s12 }
  0x22   :  { %82 = vmatpush1.msra.mxu0 %v75_v4  ;;  %v64_v15 = vld [vmem:[#allocation2 + $0x88] sm:$0xff]  ;;  %v63_v16 = vld [vmem:[#allocation2 + $0x80] sm:$0xff]  ;;  %v62_v17 = vld [vmem:[#allocation2 + $0x78] sm:$0xff] }
  0x23   :  { %83 = vmatprep.subr.mxu0 %v74_v5  ;;  %v61_v18 = vld [vmem:[#allocation2 + $0x70] sm:$0xff]  ;;  %v60_v19 = vld [vmem:[#allocation2 + $0x68] sm:$0xff]  ;;  %v59_v20 = vld [vmem:[#allocation2 + $0x60] sm:$0xff]  ;;  %p438_p13 = por %p437_p12, %p436_p11 }
  0x24   :  { %84 = vmatpush1.msra.mxu0 %v73_v6  ;;  %v58_v21 = vld [vmem:[#allocation2 + $0x58] sm:$0xff]  ;;  %v57_v22 = vld [vmem:[#allocation2 + $0x50] sm:$0xff]  ;;  %v56_v23 = vld [vmem:[#allocation2 + $0x48] sm:$0xff]  ;;  %v177_v6 = vlaneseq }
  0x25   :  { %85 = vmatprep.subr.mxu0 %v72_v7  ;;  %v55_v24 = vld [vmem:[#allocation2 + $0x40] sm:$0xff]  ;;  %v54_v25 = vld [vmem:[#allocation2 + $0x38] sm:$0xff]  ;;  %v53_v26 = vld [vmem:[#allocation2 + $0x30] sm:$0xff]  ;;  %p439_p0 = pnand %p438_p13, %p432_p10 }
  0x26   :  { %86 = vmatpush1.msra.mxu0 %v71_v8  ;;  %v52_v27 = vld [vmem:[#allocation2 + $0x28] sm:$0xff]  ;;  %v51_v28 = vld [vmem:[#allocation2 + $0x20] sm:$0xff]  ;;  %v50_v29 = vld [vmem:[#allocation2 + $0x18] sm:$0xff]  ;;  %v178_v7 = vshrl.u32 %v177_v6, 7 }
  0x27   :  { %87 = vmatprep.subr.mxu0 %v70_v9  ;;  %v49_v30 = vld [vmem:[#allocation2 + $0x10] sm:$0xff]  ;;  %v48_v31 = vld [vmem:[#allocation2 + $0x8] sm:$0xff]  ;;  %v47_v32 = vld [vmem:[#allocation2] sm:$0xff] }
  0x28   :  { %88 = vmatpush1.msra.mxu0 %v69_v10  ;;  %v46_v33 = vld [vmem:[%s533_s0] sm:$0xff]  ;;  %v203_v34 = vld [vmem:[#allocation5 + $0x78] sm:$0xff]  ;;  %v202_v35 = vld [vmem:[#allocation5 + $0x70] sm:$0xff]  ;;  %v179_v9 = vsub.s32 0, %v178_v7 }
  0x29   :  { %89 = vmatprep.subr.mxu0 %v68_v11  ;;  %344 = vmatpush3.msra.mxu1 %v203_v34  ;;  %v201_v36 = vld [vmem:[#allocation5 + $0x68] sm:$0xff]  ;;  %v200_v37 = vld [vmem:[#allocation5 + $0x60] sm:$0xff]  ;;  %v199_v38 = vld [vmem:[#allocation5 + $0x58] sm:$0xff] }
  0x2a   :  { %90 = vmatpush1.msra.mxu0 %v67_v12  ;;  %345 = vmatprep.subr.mxu1 %v463_v0  ;;  %v198_v39 = vld [vmem:[#allocation5 + $0x50] sm:$0xff]  ;;  %v197_v40 = vld [vmem:[#allocation5 + $0x48] sm:$0xff]  ;;  %v196_v41 = vld [vmem:[#allocation5 + $0x40] sm:$0xff] }
  0x2b   :  { %91 = vmatprep.subr.mxu0 %v66_v13  ;;  %346 = vmatpush3.msra.mxu1 %v202_v35  ;;  %v195_v42 = vld [vmem:[#allocation5 + $0x38] sm:$0xff]  ;;  %v194_v43 = vld [vmem:[#allocation5 + $0x30] sm:$0xff]  ;;  %v193_v44 = vld [vmem:[#allocation5 + $0x28] sm:$0xff] }
  0x2c   :  { %92 = vmatpush1.msra.mxu0 %v65_v14  ;;  %347 = vmatprep.subr.mxu1 %v463_v0  ;;  %v192_v45 = vld [vmem:[#allocation5 + $0x20] sm:$0xff]  ;;  %v191_v46 = vld [vmem:[#allocation5 + $0x18] sm:$0xff]  ;;  %v190_v47 = vld [vmem:[#allocation5 + $0x10] sm:$0xff] }
  0x2d   :  { %93 = vmatprep.subr.mxu0 %v64_v15  ;;  %348 = vmatpush3.msra.mxu1 %v201_v36  ;;  %v189_v48 = vld [vmem:[#allocation5 + $0x8] sm:$0xff]  ;;  %v188_v49 = vld [vmem:[#allocation5] sm:$0xff] }
  0x2e   :  { %94 = vmatpush1.msra.mxu0 %v63_v16  ;;  %349 = vmatprep.subr.mxu1 %v463_v0  ;;  %v150_v8 = vld [vmem:[%s536_s3] sm:$0x1]  ;;  %v151_v12 = vld [vmem:[%s536_s3 + $0x1] sm:$0x1] }
  0x2f   :  { %95 = vmatprep.subr.mxu0 %v62_v17  ;;  %350 = vmatpush3.msra.mxu1 %v200_v37 }
  0x30   :  { %96 = vmatpush1.msra.mxu0 %v61_v18  ;;  %351 = vmatprep.subr.mxu1 %v463_v0 }
  0x31   :  { %97 = vmatprep.subr.mxu0 %v60_v19  ;;  %352 = vmatpush3.msra.mxu1 %v199_v38 }
  0x32   :  { %98 = vmatpush1.msra.mxu0 %v59_v20  ;;  %353 = vmatprep.subr.mxu1 %v463_v0 }
  0x33   :  { %99 = vmatprep.subr.mxu0 %v58_v21  ;;  %354 = vmatpush3.msra.mxu1 %v198_v39 }
  0x34   :  { %100 = vmatpush1.msra.mxu0 %v57_v22  ;;  %355 = vmatprep.subr.mxu1 %v463_v0 }
  0x35   :  { %101 = vmatprep.subr.mxu0 %v56_v23  ;;  %356 = vmatpush3.msra.mxu1 %v197_v40 }
  0x36   :  { %102 = vmatpush1.msra.mxu0 %v55_v24  ;;  %357 = vmatprep.subr.mxu1 %v463_v0 }
  0x37   :  { %103 = vmatprep.subr.mxu0 %v54_v25  ;;  %358 = vmatpush3.msra.mxu1 %v196_v41  ;;  %v152_v41 = vld [vmem:[%s536_s3 + $0x2] sm:$0x1] }
  0x38   :  { %104 = vmatpush1.msra.mxu0 %v53_v26  ;;  %359 = vmatprep.subr.mxu1 %v463_v0 }
  0x39   :  { %105 = vmatprep.subr.mxu0 %v52_v27  ;;  %360 = vmatpush3.msra.mxu1 %v195_v42 }
  0x3a   :  { %106 = vmatpush1.msra.mxu0 %v51_v28  ;;  %361 = vmatprep.subr.mxu1 %v463_v0 }
  0x3b   :  { %107 = vmatprep.subr.mxu0 %v50_v29  ;;  %362 = vmatpush3.msra.mxu1 %v194_v43 }
  0x3c   :  { %108 = vmatpush1.msra.mxu0 %v49_v30  ;;  %363 = vmatprep.subr.mxu1 %v463_v0 }
  0x3d   :  { %109 = vmatprep.subr.mxu0 %v48_v31  ;;  %364 = vmatpush3.msra.mxu1 %v193_v44  ;;  %v153_v44 = vld [vmem:[%s536_s3 + $0x3] sm:$0x1] }
  0x3e   :  { %110 = vmatpush1.msra.mxu0 %v47_v32  ;;  %365 = vmatprep.subr.mxu1 %v463_v0 }
  0x3f   :  { %144 = vmatmul.mubr.f32.vlgmr.msra.gmra.mxu0 %v46_v33  ;;  %366 = vmatpush3.msra.mxu1 %v192_v45 }
  0x40   :  { %367 = vmatprep.subr.mxu1 %v463_v0 }
  0x41   :  { %368 = vmatpush3.msra.mxu1 %v191_v46 }
  0x42   :  { %369 = vmatprep.subr.mxu1 %v463_v0 }
  0x43   :  { %370 = vmatpush3.msra.mxu1 %v190_v47 }
  0x44   :  { %371 = vmatprep.subr.mxu1 %v463_v0 }
  0x45   :  { %372 = vmatpush3.msra.mxu1 %v189_v48 }
  0x46   :  { %373 = vmatprep.subr.mxu1 %v463_v0 }
  0x47   :  { %374 = vmatpush3.msra.mxu1 %v188_v49 }
  0xff   :  { %v145_v50 = vpop.f32.mrf.mxu0 }
 0x100   :  { %v154_v51 = vrot.slane %v145_v50, 4  ;;  %v161_v52 = vmul.f32 %v145_v50, %v145_v50 }
 0x102   :  { %v155_v53 = vadd.f32 %v154_v51, %v145_v50  ;;  %v162_v54 = vrot.slane %v161_v52, 4  ;;  %v147_v51 = vpop.f32.mrf.mxu0 }
 0x104   :  { %v156_v55 = vrot.slane %v155_v53, 2  ;;  %v163_v56 = vadd.f32 %v162_v54, %v161_v52 }
 0x106   :  { %v157_v57 = vadd.f32 %v156_v55, %v155_v53  ;;  %v164_v58 = vrot.slane %v163_v56, 2 }
 0x108   :  { %v158_v59 = vrot.slane %v157_v57, 1  ;;  %v165_v60 = vadd.f32 %v164_v58, %v163_v56 }
 0x10a   :  { %v159_v61 = vadd.f32 %v158_v59, %v157_v57  ;;  %v166_v62 = vrot.slane %v165_v60, 1 }
 0x10c   :  { %v160_v63 = vmul.f32 0.125, %v159_v61  ;;  %v167_v1 = vadd.f32 %v166_v62, %v165_v60 }
 0x10e   :  { %v168_v2 = vmul.f32 0.125, %v167_v1  ;;  %v169_v3 = vmul.f32 %v160_v63, %v160_v63 }
 0x110   :  { %v170_v4 = vsub.f32 %v168_v2, %v169_v3 }
 0x112   :  { %v171_v0 = vmax.f32 %v170_v4, 0.0 }
 0x114   :  { %v172_v5 = vadd.f32 1e-05, %v171_v0 }
 0x116   :  { %387 = vrsqrt.f32 %v172_v5 }
 0x123   :  { %v388_v10 = vpop.eup %387 }
 0x124   :  { %v174_v11 = vmul.f32 %v388_v10, %v150_v8 }
 0x126   :  { %v180_v13 = vrot.slane %v174_v11, %v179_v9  ;;  %v175_v14 = vmul.f32 %v174_v11, %v160_v63 }
 0x128   :  { %v176_v15 = vsub.f32 %v151_v12, %v175_v14  ;;  %v181_v16 = vmul.f32 %v180_v13, %v145_v50 }
 0x12a   :  { %v185_v17 = vrot.slane %v176_v15, %v179_v9 }
 0x12c   :  { %v186_v18 = vadd.f32 %v185_v17, %v181_v16 }
 0x12e   :  { %v187_v19 = vmax.f32 %v186_v18, 0.0 }
 0x130   :  { %376 = vmatmul.mubr.f32.vlgmr.msra.gmra.mxu1 %v187_v19 }
 0x1f0   :  { %v270_v20 = vpop.f32.mrf.mxu1 }
 0x1f1   :  { %v274_v21 = vrot.slane %v270_v20, 4  ;;  %v281_v22 = vmul.f32 %v270_v20, %v270_v20 }
 0x1f2   :  { %v377_v23 = vpop.f32.mrf.mxu1 }
 0x1f3   :  { %v275_v24 = vadd.f32 %v274_v21, %v270_v20  ;;  %v282_v25 = vrot.slane %v281_v22, 4 }
 0x1f5   :  { %v276_v26 = vrot.slane %v275_v24, 2  ;;  %v283_v27 = vadd.f32 %v282_v25, %v281_v22 }
 0x1f7   :  { %v277_v28 = vadd.f32 %v276_v26, %v275_v24  ;;  %v284_v29 = vrot.slane %v283_v27, 2 }
 0x1f9   :  { %v278_v30 = vrot.slane %v277_v28, 1  ;;  %v285_v31 = vadd.f32 %v284_v29, %v283_v27 }
 0x1fb   :  { %v279_v32 = vadd.f32 %v278_v30, %v277_v28  ;;  %v286_v33 = vrot.slane %v285_v31, 1 }
 0x1fd   :  { %v280_v34 = vmul.f32 0.125, %v279_v32  ;;  %v287_v35 = vadd.f32 %v286_v33, %v285_v31 }
 0x1ff   :  { %v288_v36 = vmul.f32 0.125, %v287_v35  ;;  %v289_v37 = vmul.f32 %v280_v34, %v280_v34 }
 0x201   :  { %v290_v38 = vsub.f32 %v288_v36, %v289_v37 }
 0x203   :  { %v291_v39 = vmax.f32 %v290_v38, 0.0 }
 0x205   :  { %v292_v40 = vadd.f32 1e-05, %v291_v39 }
 0x207   :  { %389 = vrsqrt.f32 %v292_v40 }
 0x214   :  { %v390_v42 = vpop.eup %389 }
 0x215   :  { %v294_v43 = vmul.f32 %v390_v42, %v152_v41 }
 0x217   :  { %v295_v45 = vmul.f32 %v294_v43, %v280_v34  ;;  %v300_v46 = vrot.slane %v294_v43, %v179_v9 }
 0x219   :  { %v296_v47 = vsub.f32 %v153_v44, %v295_v45  ;;  %v301_v48 = vmul.f32 %v300_v46, %v270_v20 }
 0x21b   :  { %v305_v49 = vrot.slane %v296_v47, %v179_v9 }
 0x21d   :  { %v306_v50 = vadd.f32 %v305_v49, %v301_v48 }
 0x21f   :  { %v307_v52 = vadd.f32 %v306_v50, %v147_v51 }
 0x221   :  { %v308_v53 = vmax.f32 %v307_v52, 0.0 }
 0x223   :  { %309 = vst [vmem:[#allocation7] sm:$0xff] %v308_v53 }
 0x224   :  { %442 = shalt.err (!%p439_p0)
}
 0x225   :  { %319 = dma.vmem_to_hbm [thread:$0]  %s317_s11, 128, %s537_s4, [#allocation4]  }
 0x226   :  { %455 = dma.done.wait [#allocation4], 128  }
 0x227   :  { %456 = vsyncadd [#allocation4], 4294967168 }
 0x228   :  { %323 = vsyncpa [#allocation3], 1 }
 0x229   :  { %324 = vsyncpa [#allocation6], 1 }
 0x22a   :  { %325 = vsyncpa [#allocation4], 1 }

</bundles_post_ra>
